<compile_context>
chip_gen: v7x
topology: tpu7x:2x2x1
jax: 0.10.0
libtpu: 0.0.40
codegen_flags: <defaults>
</compile_context>

<pallas_src>
import jax
import jax.numpy as jnp
from jax.experimental import pallas as pl
from jax.experimental.pallas import tpu as pltpu

_EPS = 1e-5
_VMEM_LIMIT = 32 * 1024 * 1024  # explicit scoped-VMEM cap, fits v5e/v6e/v7x


def _round_up(x, m):
    return (x + m - 1) // m * m


def _cparams(*sems):
    return pltpu.CompilerParams(dimension_semantics=sems,
                                vmem_limit_bytes=_VMEM_LIMIT)


# ----------------------------------------------------------------------------
# Pallas kernels
# ----------------------------------------------------------------------------
def _matmul_kernel(x_ref, w_ref, o_ref):
    """One M-tile of the im2col conv: o = x_tile @ W (bf16 in, f32 accumulate)."""
    o_ref[...] = jnp.dot(x_ref[...], w_ref[...],
                         preferred_element_type=jnp.float32).astype(o_ref.dtype)


def _bn_stats_kernel(x_ref, sum_ref, sq_ref):
    """Pass 1 of BN: per-channel sum / sum-of-squares, accumulated over M tiles."""
    @pl.when(pl.program_id(0) == 0)
    def _():
        sum_ref[...] = jnp.zeros_like(sum_ref)
        sq_ref[...] = jnp.zeros_like(sq_ref)

    x = x_ref[...].astype(jnp.float32)
    sum_ref[...] += jnp.sum(x, axis=0, keepdims=True)
    sq_ref[...] += jnp.sum(x * x, axis=0, keepdims=True)


def _bn_relu_kernel(y_ref, scale_ref, shift_ref, o_ref):
    """Pass 2 of BN: y*scale + shift, then ReLU (scale/shift precomputed per-channel)."""
    y = y_ref[...].astype(jnp.float32)
    o_ref[...] = jnp.maximum(y * scale_ref[...] + shift_ref[...],
                             0.0).astype(o_ref.dtype)


def _bn_add_relu_kernel(y_ref, scale_ref, shift_ref, res_ref, o_ref):
    """BN normalize + identity-residual add + ReLU (fused block tail)."""
    y = y_ref[...].astype(jnp.float32)
    out = y * scale_ref[...] + shift_ref[...] + res_ref[...].astype(jnp.float32)
    o_ref[...] = jnp.maximum(out, 0.0).astype(o_ref.dtype)


def _bn_proj_add_relu_kernel(y_ref, scale_ref, shift_ref,
                             xs_ref, w3_ref, b3_ref, o_ref):
    """BN normalize + fused 1x1-projection residual (MXU) + bias + add + ReLU."""
    y = y_ref[...].astype(jnp.float32)
    skip = jnp.dot(xs_ref[...], w3_ref[...],
                   preferred_element_type=jnp.float32) + b3_ref[...]
    out = y * scale_ref[...] + shift_ref[...] + skip
    o_ref[...] = jnp.maximum(out, 0.0).astype(o_ref.dtype)


# ----------------------------------------------------------------------------
# Pallas-backed ops
# ----------------------------------------------------------------------------
def _conv_matmul(xcol, w_mat, *, tm, m_pad):
    """(M, K) @ (K, Cout) tiled over M. Returns (m_pad, Cp) f32 (lane-padded)."""
    M, K = xcol.shape
    Cout = w_mat.shape[1]
    Kp = _round_up(K, 128)
    Cp = _round_up(Cout, 128)
    x_p = jnp.pad(xcol.astype(jnp.bfloat16), ((0, m_pad - M), (0, Kp - K)))
    w_p = jnp.pad(w_mat.astype(jnp.bfloat16), ((0, Kp - K), (0, Cp - Cout)))
    return pl.pallas_call(
        _matmul_kernel,
        out_shape=jax.ShapeDtypeStruct((m_pad, Cp), jnp.float32),
        grid=(m_pad // tm,),
        in_specs=[pl.BlockSpec((tm, Kp), lambda i: (i, 0)),
                  pl.BlockSpec((Kp, Cp), lambda i: (0, 0))],
        out_specs=pl.BlockSpec((tm, Cp), lambda i: (i, 0)),
        compiler_params=_cparams("parallel"),
    )(x_p, w_p)


def _bn_scale_shift(y_pad, count, gamma, beta, *, tm):
    """Tiled batch-stats reduction -> per-channel (scale, shift) for training-mode BN."""
    m_pad, Cp = y_pad.shape
    s, sq = pl.pallas_call(
        _bn_stats_kernel,
        out_shape=(jax.ShapeDtypeStruct((1, Cp), jnp.float32),
                   jax.ShapeDtypeStruct((1, Cp), jnp.float32)),
        grid=(m_pad // tm,),
        in_specs=[pl.BlockSpec((tm, Cp), lambda i: (i, 0))],
        out_specs=(pl.BlockSpec((1, Cp), lambda i: (0, 0)),
                   pl.BlockSpec((1, Cp), lambda i: (0, 0))),
        compiler_params=_cparams("arbitrary"),
    )(y_pad)
    C = gamma.shape[0]
    g = jnp.pad(gamma.astype(jnp.float32), (0, Cp - C)).reshape(1, Cp)
    b = jnp.pad(beta.astype(jnp.float32), (0, Cp - C)).reshape(1, Cp)
    mean = s / count
    var = jnp.maximum(sq / count - mean * mean, 0.0)   # biased var (PyTorch BN fwd)
    scale = g * jax.lax.rsqrt(var + _EPS)
    shift = b - mean * scale
    return scale, shift


def _bn_relu(y_pad, scale, shift, *, tm, out_dtype):
    m_pad, Cp = y_pad.shape
    return pl.pallas_call(
        _bn_relu_kernel,
        out_shape=jax.ShapeDtypeStruct((m_pad, Cp), out_dtype),
        grid=(m_pad // tm,),
        in_specs=[pl.BlockSpec((tm, Cp), lambda i: (i, 0)),
                  pl.BlockSpec((1, Cp), lambda i: (0, 0)),
                  pl.BlockSpec((1, Cp), lambda i: (0, 0))],
        out_specs=pl.BlockSpec((tm, Cp), lambda i: (i, 0)),
        compiler_params=_cparams("parallel"),
    )(y_pad, scale, shift)


def _bn_add_relu(y_pad, scale, shift, res_pad, *, tm):
    m_pad, Cp = y_pad.shape
    return pl.pallas_call(
        _bn_add_relu_kernel,
        out_shape=jax.ShapeDtypeStruct((m_pad, Cp), jnp.float32),
        grid=(m_pad // tm,),
        in_specs=[pl.BlockSpec((tm, Cp), lambda i: (i, 0)),
                  pl.BlockSpec((1, Cp), lambda i: (0, 0)),
                  pl.BlockSpec((1, Cp), lambda i: (0, 0)),
                  pl.BlockSpec((tm, Cp), lambda i: (i, 0))],
        out_specs=pl.BlockSpec((tm, Cp), lambda i: (i, 0)),
        compiler_params=_cparams("parallel"),
    )(y_pad, scale, shift, res_pad)


def _bn_proj_add_relu(y_pad, scale, shift, xs_pad, w3_pad, b3_pad, *, tm):
    m_pad, Cp = y_pad.shape
    Cinp = xs_pad.shape[1]
    return pl.pallas_call(
        _bn_proj_add_relu_kernel,
        out_shape=jax.ShapeDtypeStruct((m_pad, Cp), jnp.float32),
        grid=(m_pad // tm,),
        in_specs=[pl.BlockSpec((tm, Cp), lambda i: (i, 0)),
                  pl.BlockSpec((1, Cp), lambda i: (0, 0)),
                  pl.BlockSpec((1, Cp), lambda i: (0, 0)),
                  pl.BlockSpec((tm, Cinp), lambda i: (i, 0)),
                  pl.BlockSpec((Cinp, Cp), lambda i: (0, 0)),
                  pl.BlockSpec((1, Cp), lambda i: (0, 0))],
        out_specs=pl.BlockSpec((tm, Cp), lambda i: (i, 0)),
        compiler_params=_cparams("parallel"),
    )(y_pad, scale, shift, xs_pad, w3_pad, b3_pad)


# ----------------------------------------------------------------------------
# im2col glue (plain JAX; built in bf16 to halve its HBM footprint)
# ----------------------------------------------------------------------------
def _im2col(x_nhwc, KH, KW, stride, padding):
    N, H, W, C = x_nhwc.shape
    Ho = (H + 2 * padding - KH) // stride + 1
    Wo = (W + 2 * padding - KW) // stride + 1
    xp = jnp.pad(x_nhwc, ((0, 0), (padding, padding), (padding, padding), (0, 0)))
    cols = []
    for kh in range(KH):
        for kw in range(KW):
            cols.append(xp[:, kh:kh + (Ho - 1) * stride + 1:stride,
                              kw:kw + (Wo - 1) * stride + 1:stride, :])
    xcol = jnp.concatenate(cols, axis=-1).reshape(N * Ho * Wo, KH * KW * C)
    return xcol, Ho, Wo


# ----------------------------------------------------------------------------
# Residual module (Pallas) and pure-JAX reference
# ----------------------------------------------------------------------------
def residual_forward_pallas(x_nchw, p, *, use_1x1conv=False, strides=1):
    x = jnp.transpose(x_nchw, (0, 2, 3, 1)).astype(jnp.float32)  # NHWC
    N, H, W, Cin = x.shape
    Cout = p["w1"].shape[-1]
    if not use_1x1conv:
        assert Cin == Cout and strides == 1, \
            "identity skip requires Cin == Cout and strides == 1"

    # conv1: 3x3 stride=strides pad=1 (b1 dropped: BN subtracts the batch mean)
    xcol1, Ho, Wo = _im2col(x.astype(jnp.bfloat16), 3, 3, strides, 1)
    M = N * Ho * Wo
    tm = 512 if M >= 512 else _round_up(M, 8)
    m_pad = _round_up(M, tm)
    Cp = _round_up(Cout, 128)

    y1 = _conv_matmul(xcol1, p["w1"].reshape(9 * Cin, Cout), tm=tm, m_pad=m_pad)

    # BN1 (tiled two-pass) + ReLU, emitted in bf16 (feeds conv2's matmul anyway)
    sc1, sh1 = _bn_scale_shift(y1, M, p["g1"], p["be1"], tm=tm)
    a1 = _bn_relu(y1, sc1, sh1, tm=tm, out_dtype=jnp.bfloat16)

    # conv2: 3x3 stride=1 pad=1 (b2 dropped)
    a1_nhwc = a1[:M, :Cout].reshape(N, Ho, Wo, Cout)
    xcol2, _, _ = _im2col(a1_nhwc, 3, 3, 1, 1)
    y2 = _conv_matmul(xcol2, p["w2"].reshape(9 * Cout, Cout), tm=tm, m_pad=m_pad)

    # BN2 stats
    sc2, sh2 = _bn_scale_shift(y2, M, p["g2"], p["be2"], tm=tm)

    # skip path + final normalize + add + ReLU (fused, one kernel)
    if use_1x1conv:
        Cinp = _round_up(Cin, 128)
        xs = x[:, ::strides, ::strides, :].reshape(M, Cin)
        xs_pad = jnp.pad(xs.astype(jnp.bfloat16), ((0, m_pad - M), (0, Cinp - Cin)))
        w3_pad = jnp.pad(p["w3"].reshape(Cin, Cout).astype(jnp.bfloat16),
                         ((0, Cinp - Cin), (0, Cp - Cout)))
        b3_pad = jnp.pad(p["b3"].astype(jnp.float32), (0, Cp - Cout)).reshape(1, Cp)
        out = _bn_proj_add_relu(y2, sc2, sh2, xs_pad, w3_pad, b3_pad, tm=tm)
    else:
        res = jnp.pad(x.reshape(M, Cin), ((0, m_pad - M), (0, Cp - Cin)))
        out = _bn_add_relu(y2, sc2, sh2, res, tm=tm)

    out = out[:M, :Cout].reshape(N, Ho, Wo, Cout)
    return jnp.transpose(out, (0, 3, 1, 2))  # back to NCHW


def residual_forward_ref(x_nchw, p, *, use_1x1conv=False, strides=1):
    def conv(x, w, b, stride, pad):
        y = jax.lax.conv_general_dilated(
            x, w, window_strides=(stride, stride),
            padding=[(pad, pad), (pad, pad)],
            dimension_numbers=("NHWC", "HWIO", "NHWC"),
            precision=jax.lax.Precision.HIGHEST)
        return y + b.reshape(1, 1, 1, -1)

    def bn(x, g, be):
        mean = x.mean(axis=(0, 1, 2), keepdims=True)
        var = ((x - mean) ** 2).mean(axis=(0, 1, 2), keepdims=True)
        return ((x - mean) * jax.lax.rsqrt(var + _EPS) * g.reshape(1, 1, 1, -1)
                + be.reshape(1, 1, 1, -1))

    x = jnp.transpose(x_nchw, (0, 2, 3, 1)).astype(jnp.float32)
    y = jax.nn.relu(bn(conv(x, p["w1"], p["b1"], strides, 1), p["g1"], p["be1"]))
    y = bn(conv(y, p["w2"], p["b2"], 1, 1), p["g2"], p["be2"])
    skip = conv(x, p["w3"], p["b3"], strides, 0) if use_1x1conv else x
    return jnp.transpose(jax.nn.relu(y + skip), (0, 3, 1, 2))


def make_params(key, input_channels, num_channels, use_1x1conv):
    ks = jax.random.split(key, 6)
    scale1 = 1.0 / (3 * 3 * input_channels) ** 0.5
    scale2 = 1.0 / (3 * 3 * num_channels) ** 0.5
    p = {
        "w1": jax.random.normal(ks[0], (3, 3, input_channels, num_channels),
                                jnp.float32) * scale1,
        "b1": jax.random.normal(ks[1], (num_channels,), jnp.float32) * 0.1,
        "w2": jax.random.normal(ks[2], (3, 3, num_channels, num_channels),
                                jnp.float32) * scale2,
        "b2": jax.random.normal(ks[3], (num_channels,), jnp.float32) * 0.1,
        "g1": jnp.ones((num_channels,), jnp.float32),
        "be1": jnp.zeros((num_channels,), jnp.float32),
        "g2": jnp.ones((num_channels,), jnp.float32),
        "be2": jnp.zeros((num_channels,), jnp.float32),
    }
    if use_1x1conv:
        p["w3"] = jax.random.normal(ks[4], (1, 1, input_channels, num_channels),
                                    jnp.float32) / input_channels ** 0.5
        p["b3"] = jax.random.normal(ks[5], (num_channels,), jnp.float32) * 0.1
    return p


if __name__ == "__main__":
    key = jax.random.PRNGKey(0)
    kx, kp1, kp2 = jax.random.split(key, 3)

    # Config A: identity skip (use_1x1conv=False, strides=1), Cin == Cout
    x_a = jax.random.normal(kx, (2, 4, 16, 16), jnp.float32)  # NCHW like PyTorch
    p_a = make_params(kp1, input_channels=4, num_channels=4, use_1x1conv=False)
    out_a = residual_forward_pallas(x_a, p_a, use_1x1conv=False, strides=1)
    ref_a = residual_forward_ref(x_a, p_a, use_1x1conv=False, strides=1)

    # Config B: projection skip (use_1x1conv=True, strides=2), Cin=4 -> Cout=8
    p_b = make_params(kp2, input_channels=4, num_channels=8, use_1x1conv=True)
    out_b = residual_forward_pallas(x_a, p_b, use_1x1conv=True, strides=2)
    ref_b = residual_forward_ref(x_a, p_b, use_1x1conv=True, strides=2)

    jax.block_until_ready((out_a, out_b))

    assert out_a.shape == (2, 4, 16, 16), out_a.shape
    assert out_b.shape == (2, 8, 8, 8), out_b.shape
    # bf16 matmul inputs (f32 accumulate) vs f32 HIGHEST reference -> looser tolerance.
    assert jnp.allclose(out_a, ref_a, rtol=3e-2, atol=3e-2), "config A mismatch"
    assert jnp.allclose(out_b, ref_b, rtol=3e-2, atol=3e-2), "config B mismatch"

    print("KERNEL_OK")
</pallas_src>

<mosaic_0001>
module attributes {stable_mosaic.version = 11 : i64} {
  func.func @_matmul_kernel(%arg0: i32, %arg1: memref<512x128xbf16, #tpu.memory_space<vmem>>, %arg2: memref<128x128xbf16, #tpu.memory_space<vmem>>, %arg3: memref<512x128xf32, #tpu.memory_space<vmem>>) attributes {dimension_semantics = [#tpu.dimension_semantics<parallel>], iteration_bounds = array<i64: 1>, scalar_prefetch = 0 : i64, scratch_operands = 0 : i64, tpu.core_type = #tpu.core_type<tc>, window_params = [{transform_indices = @transform_0, window_bounds = array<i64: 512, 128>}, {pipeline_mode = #tpu.pipeline_mode<synchronous>, transform_indices = @transform_1, window_bounds = array<i64: 128, 128>}, {transform_indices = @transform_2, window_bounds = array<i64: 512, 128>}]} {
    %c0 = arith.constant 0 : index
    %c0_0 = arith.constant 0 : index
    %0 = vector.load %arg1[%c0, %c0_0] : memref<512x128xbf16, #tpu.memory_space<vmem>>, vector<512x128xbf16>
    %c0_1 = arith.constant 0 : index
    %c0_2 = arith.constant 0 : index
    %1 = vector.load %arg2[%c0_1, %c0_2] : memref<128x128xbf16, #tpu.memory_space<vmem>>, vector<128x128xbf16>
    %cst = arith.constant dense<0.000000e+00> : vector<512x128xf32>
    %2 = tpu.matmul %0, %1, %cst {dimension_numbers = #tpu.dot_dimension_numbers<[1], [0], [0], [1], [0, 0, 1, 1], [], []>} : vector<512x128xbf16>, vector<128x128xbf16>, vector<512x128xf32> -> vector<512x128xf32>
    %c0_3 = arith.constant 0 : index
    %c0_4 = arith.constant 0 : index
    %3 = vector.load %arg3[%c0_3, %c0_4] : memref<512x128xf32, #tpu.memory_space<vmem>>, vector<512x128xf32>
    tpu.vector_store %arg3[%c0_3, %c0_4], %2 {strides = array<i32>} : memref<512x128xf32, #tpu.memory_space<vmem>>, vector<512x128xf32>,
    return
  }
  func.func @transform_0(%arg0: i32) -> (i32, i32) {
    %c0_i32 = arith.constant 0 : i32
    %c0_i32_0 = arith.constant 0 : i32
    return %arg0, %c0_i32 : i32, i32
  }
  func.func @transform_1(%arg0: i32) -> (i32, i32) {
    %c0_i32 = arith.constant 0 : i32
    %c0_i32_0 = arith.constant 0 : i32
    %c0_i32_1 = arith.constant 0 : i32
    return %c0_i32, %c0_i32_0 : i32, i32
  }
  func.func @transform_2(%arg0: i32) -> (i32, i32) {
    %c0_i32 = arith.constant 0 : i32
    %c0_i32_0 = arith.constant 0 : i32
    return %arg0, %c0_i32 : i32, i32
  }
}

</mosaic_0001>

<bundles_post_ra>
// kernel: tpu_custom_call.1
= control target key start
LH: loop header
LB: loop body
LE: loop exit
PB: predicated region body
PF: predicated region fallthrough
CT: control target
= control target key end

     0   :  { %7 = vsyncpa [#allocation3], 0  ;;  %s1085_s0 = inlined_call_operand.hbm [shape: bf16[512,128], index: 0, kind: input, shape index: {}]   ;;  %s1086_s1 = inlined_call_operand.hbm [shape: bf16[128,128], index: 1, kind: input, shape index: {}]   ;;  %s1087_s2 = inlined_call_operand.hbm [shape: f32[512,128], index: 2, kind: output, shape index: {}]  }
   0x1   :  { %8 = vsyncpa [#allocation6], 0 }
   0x2   :  { %9 = vsyncpa [#allocation4], 0  ;;  %s1027_s9 = smov [#allocation2]   ;;  %s955_s13 = scalar_lea.hbm %s1085_s0, 4096 }
   0x3   :  { %s15_s10 = sshll.u32 %s1027_s9, 4  ;;  %p956_p0 = scmp.ne.s32.totalorder %s1085_s0, %s955_s13  ;;  %s16_s10 = int_to_ptr.vmem [resolvable:$true] %s15_s10 }
   0x4   :  { %p959_p1 = scmp.lt.u32.totalorder %s955_s13, %s1085_s0 }
   0x6   :  { %p961_p2 = pnand %p959_p1, %p956_p0 }
   0x8   :  { %964 = shalt.err (!%p961_p2)
}
   0x9   :  { %s965_s18 = scalar_lea.vmem %s16_s10, 4096  ;;  %p970_p4 = scmp.lt.s32.totalorder %s16_s10, %s16_s10 }
   0xa   :  { %p966_p3 = scmp.ne.s32.totalorder %s16_s10, %s965_s18  ;;  %p971_p5 = scmp.lt.s32.totalorder %s965_s18, %s965_s18 }
   0xc   :  { %p972_p6 = por %p971_p5, %p970_p4 }
   0xe   :  { %p973_p7 = pnand %p972_p6, %p966_p3 }
  0x10   :  { %976 = shalt.err (!%p973_p7)
}
  0x11   :  { %s1028_s19 = smov 64   ;;  %s1029_s20 = smov 4  }
  0x12   :  { %21 = dma.hbm_to_vmem [thread:$0]  %s1085_s0, 4096, %s16_s10, [#allocation3], %s1028_s19, %s1028_s19, %s1029_s20  }
  0x13   :  { %s1030_s23 = smov [#allocation5]   ;;  %s977_s27 = scalar_lea.hbm %s1086_s1, 1024 }
  0x14   :  { %s27_s24 = sshll.u32 %s1030_s23, 4  ;;  %p978_p8 = scmp.ne.s32.totalorder %s1086_s1, %s977_s27  ;;  %s28_s24 = int_to_ptr.vmem [resolvable:$true] %s27_s24 }
  0x15   :  { %p981_p9 = scmp.lt.u32.totalorder %s977_s27, %s1086_s1 }
  0x17   :  { %p983_p10 = pnand %p981_p9, %p978_p8 }
  0x19   :  { %986 = shalt.err (!%p983_p10)
}
  0x1a   :  { %s987_s4 = scalar_lea.vmem %s28_s24, 1024  ;;  %p992_p12 = scmp.lt.s32.totalorder %s28_s24, %s28_s24 }
  0x1b   :  { %p988_p11 = scmp.ne.s32.totalorder %s28_s24, %s987_s4  ;;  %p993_p13 = scmp.lt.s32.totalorder %s987_s4, %s987_s4 }
  0x1d   :  { %p994_p0 = por %p993_p13, %p992_p12 }
  0x1f   :  { %p995_p1 = pnand %p994_p0, %p988_p11 }
  0x21   :  { %998 = shalt.err (!%p995_p1)
}
  0x22   :  { %33 = dma.hbm_to_vmem [thread:$0]  %s1086_s1, 1024, %s28_s24, [#allocation6], %s1028_s19, %s1028_s19, %s1029_s20  }
  0x23   :  { %1021 = dma.done.wait [#allocation3], 4096  }
  0x24   :  { %1022 = vsyncadd [#allocation3], 4294963200 }
  0x25   :  { %1023 = dma.done.wait [#allocation6], 1024  }
  0x26   :  { %1024 = vsyncadd [#allocation6], 4294966272  ;;  %v915_v0 = vld [vmem:[#allocation5] sm:$0xff]   ;;  %v916_v1 = vld [vmem:[#allocation5 + $0x8] sm:$0xff]   ;;  %s1031_s1 = smov [#allocation7]  }
  0x27   :  { %812 = vmatprep.subr.bf16.mxu0 %v915_v0  ;;  %892 = vmatprep.subr.bf16.mxu1 %v915_v0  ;;  %v917_v2 = vld [vmem:[#allocation5 + $0x10] sm:$0xff]   ;;  %v918_v3 = vld [vmem:[#allocation5 + $0x18] sm:$0xff]   ;;  %v923_v4 = vld [vmem:[#allocation2] sm:$0xff]   ;;  %s719_s6 = sshll.u32 %s1031_s1, 4  ;;  %s720_s6 = int_to_ptr.vmem [resolvable:$true] %s719_s6 }
  0x28   :  { %813 = vmatpush3.bf16.msra.mxu0 %v915_v0  ;;  %900 = vmatpush3.bf16.msra.mxu1 %v915_v0  ;;  %v924_v5 = vld [vmem:[#allocation2 + $0x80] sm:$0xff]   ;;  %v920_v7 = vld [vmem:[#allocation5 + $0x28] sm:$0xff]   ;;  %v921_v8 = vld [vmem:[#allocation5 + $0x30] sm:$0xff]   ;;  %s999_s7 = scalar_lea.vmem %s720_s6, 8192  ;;  %p1004_p3 = scmp.lt.s32.totalorder %s720_s6, %s720_s6 }
  0x29   :  { %814 = vmatprep.subr.bf16.mxu0 %v916_v1  ;;  %893 = vmatprep.subr.bf16.mxu1 %v916_v1  ;;  %v919_v6 = vld [vmem:[#allocation5 + $0x20] sm:$0xff]   ;;  %v922_v9 = vld [vmem:[#allocation5 + $0x38] sm:$0xff]   ;;  %v925_v10 = vld [vmem:[#allocation2 + $0x8] sm:$0xff]   ;;  %p1000_p2 = scmp.ne.s32.totalorder %s720_s6, %s999_s7  ;;  %p1005_p4 = scmp.lt.s32.totalorder %s999_s7, %s999_s7 }
  0x2a   :  { %828 = vmatprep.mubr.bf16.mxu0 %v923_v4  ;;  %860 = vmatprep.mubr.bf16.mxu1 %v924_v5  ;;  %v926_v11 = vld [vmem:[#allocation2 + $0x88] sm:$0xff]   ;;  %v927_v12 = vld [vmem:[#allocation2 + $0x10] sm:$0xff]   ;;  %v929_v14 = vld [vmem:[#allocation2 + $0x18] sm:$0xff]  }
  0x2b   :  { %v928_v13 = vld [vmem:[#allocation2 + $0x90] sm:$0xff]   ;;  %v930_v15 = vld [vmem:[#allocation2 + $0x98] sm:$0xff]   ;;  %v931_v16 = vld [vmem:[#allocation2 + $0x20] sm:$0xff]   ;;  %p1006_p5 = por %p1005_p4, %p1004_p3 }
  0x2c   :  { %815 = vmatpush3.bf16.msra.mxu0 %v916_v1  ;;  %901 = vmatpush3.bf16.msra.mxu1 %v916_v1  ;;  %v932_v17 = vld [vmem:[#allocation2 + $0xa0] sm:$0xff]   ;;  %v933_v18 = vld [vmem:[#allocation2 + $0x28] sm:$0xff]   ;;  %v935_v20 = vld [vmem:[#allocation2 + $0x30] sm:$0xff]  }
  0x2d   :  { %816 = vmatprep.subr.bf16.mxu0 %v917_v2  ;;  %894 = vmatprep.subr.bf16.mxu1 %v917_v2  ;;  %v934_v19 = vld [vmem:[#allocation2 + $0xa8] sm:$0xff]   ;;  %v936_v21 = vld [vmem:[#allocation2 + $0xb0] sm:$0xff]   ;;  %v937_v22 = vld [vmem:[#allocation2 + $0x38] sm:$0xff]   ;;  %p1007_p6 = pnand %p1006_p5, %p1000_p2 }
  0x2e   :  { %v938_v23 = vld [vmem:[#allocation2 + $0xb8] sm:$0xff]   ;;  %v939_v24 = vld [vmem:[#allocation2 + $0x40] sm:$0xff]   ;;  %v941_v26 = vld [vmem:[#allocation2 + $0x48] sm:$0xff]  }
  0x2f   :  { %v940_v25 = vld [vmem:[#allocation2 + $0xc0] sm:$0xff]   ;;  %v942_v27 = vld [vmem:[#allocation2 + $0xc8] sm:$0xff]   ;;  %v943_v28 = vld [vmem:[#allocation2 + $0x50] sm:$0xff]  }
  0x30   :  { %817 = vmatpush3.bf16.msra.mxu0 %v917_v2  ;;  %902 = vmatpush3.bf16.msra.mxu1 %v917_v2  ;;  %v944_v29 = vld [vmem:[#allocation2 + $0xd0] sm:$0xff]   ;;  %v945_v30 = vld [vmem:[#allocation2 + $0x58] sm:$0xff]   ;;  %v947_v32 = vld [vmem:[#allocation2 + $0x60] sm:$0xff]  }
  0x31   :  { %818 = vmatprep.subr.bf16.mxu0 %v918_v3  ;;  %895 = vmatprep.subr.bf16.mxu1 %v918_v3  ;;  %v946_v31 = vld [vmem:[#allocation2 + $0xd8] sm:$0xff]   ;;  %v948_v33 = vld [vmem:[#allocation2 + $0xe0] sm:$0xff]   ;;  %v949_v34 = vld [vmem:[#allocation2 + $0x68] sm:$0xff]  }
  0x32   :  { %v950_v35 = vld [vmem:[#allocation2 + $0xe8] sm:$0xff]   ;;  %v951_v36 = vld [vmem:[#allocation2 + $0x70] sm:$0xff]   ;;  %v953_v38 = vld [vmem:[#allocation2 + $0x78] sm:$0xff]  }
  0x33   :  { %v952_v37 = vld [vmem:[#allocation2 + $0xf0] sm:$0xff]   ;;  %v954_v39 = vld [vmem:[#allocation2 + $0xf8] sm:$0xff]  }
  0x34   :  { %819 = vmatpush3.bf16.msra.mxu0 %v918_v3  ;;  %903 = vmatpush3.bf16.msra.mxu1 %v918_v3 }
  0x35   :  { %820 = vmatprep.subr.bf16.mxu0 %v919_v6  ;;  %896 = vmatprep.subr.bf16.mxu1 %v919_v6 }
  0x38   :  { %821 = vmatpush3.bf16.msra.mxu0 %v919_v6  ;;  %904 = vmatpush3.bf16.msra.mxu1 %v919_v6 }
  0x39   :  { %822 = vmatprep.subr.bf16.mxu0 %v920_v7  ;;  %897 = vmatprep.subr.bf16.mxu1 %v920_v7 }
  0x3c   :  { %823 = vmatpush3.bf16.msra.mxu0 %v920_v7  ;;  %905 = vmatpush3.bf16.msra.mxu1 %v920_v7 }
  0x3d   :  { %824 = vmatprep.subr.bf16.mxu0 %v921_v8  ;;  %898 = vmatprep.subr.bf16.mxu1 %v921_v8 }
  0x40   :  { %825 = vmatpush3.bf16.msra.mxu0 %v921_v8  ;;  %906 = vmatpush3.bf16.msra.mxu1 %v921_v8 }
  0x41   :  { %826 = vmatprep.subr.bf16.mxu0 %v922_v9  ;;  %899 = vmatprep.subr.bf16.mxu1 %v922_v9 }
  0x44   :  { %827 = vmatpush3.bf16.msra.mxu0 %v922_v9  ;;  %907 = vmatpush3.bf16.msra.mxu1 %v922_v9 }
  0x47   :  { %829 = vmatmul.mubr.bf16.vlgmr.msra.gmra.mrb[0].mxu0 %v925_v10  ;;  %861 = vmatmul.mubr.bf16.vlgmr.msra.gmra.mrb[0].mxu1 %v926_v11 }
  0x48   :  { %832 = vmatprep.mubr.bf16.mxu0 %v927_v12  ;;  %864 = vmatprep.mubr.bf16.mxu1 %v928_v13 }
  0x4f   :  { %833 = vmatmul.mubr.bf16.gmra.mrb[4].mxu0 %v929_v14  ;;  %865 = vmatmul.mubr.bf16.gmra.mrb[4].mxu1 %v930_v15 }
  0x50   :  { %836 = vmatprep.mubr.bf16.mxu0 %v931_v16  ;;  %868 = vmatprep.mubr.bf16.mxu1 %v932_v17 }
  0x57   :  { %837 = vmatmul.mubr.bf16.gmra.mrb[8].mxu0 %v933_v18  ;;  %869 = vmatmul.mubr.bf16.gmra.mrb[8].mxu1 %v934_v19 }
  0x58   :  { %840 = vmatprep.mubr.bf16.mxu0 %v935_v20  ;;  %872 = vmatprep.mubr.bf16.mxu1 %v936_v21 }
  0x5f   :  { %841 = vmatmul.mubr.bf16.gmra.mrb[12].mxu0 %v937_v22  ;;  %873 = vmatmul.mubr.bf16.gmra.mrb[12].mxu1 %v938_v23 }
  0x60   :  { %844 = vmatprep.mubr.bf16.mxu0 %v939_v24  ;;  %876 = vmatprep.mubr.bf16.mxu1 %v940_v25 }
  0x67   :  { %845 = vmatmul.mubr.bf16.gmra.mrb[16].mxu0 %v941_v26  ;;  %877 = vmatmul.mubr.bf16.gmra.mrb[16].mxu1 %v942_v27 }
  0x68   :  { %848 = vmatprep.mubr.bf16.mxu0 %v943_v28  ;;  %880 = vmatprep.mubr.bf16.mxu1 %v944_v29 }
  0x6f   :  { %849 = vmatmul.mubr.bf16.gmra.mrb[20].mxu0 %v945_v30  ;;  %881 = vmatmul.mubr.bf16.gmra.mrb[20].mxu1 %v946_v31 }
  0x70   :  { %852 = vmatprep.mubr.bf16.mxu0 %v947_v32  ;;  %884 = vmatprep.mubr.bf16.mxu1 %v948_v33 }
  0x77   :  { %853 = vmatmul.mubr.bf16.gmra.mrb[24].mxu0 %v949_v34  ;;  %885 = vmatmul.mubr.bf16.gmra.mrb[24].mxu1 %v950_v35 }
  0x78   :  { %856 = vmatprep.mubr.bf16.mxu0 %v951_v36  ;;  %888 = vmatprep.mubr.bf16.mxu1 %v952_v37 }
  0x7f   :  { %857 = vmatmul.mubr.bf16.gmra.mrb[28].mxu0 %v953_v38  ;;  %889 = vmatmul.mubr.bf16.gmra.mrb[28].mxu1 %v954_v39 }
 0x11a   :  { %v830_v40 = vpop.f32.mrb[0].mxu0  ;;  %v862_v41 = vpop.f32.mrb[0].mxu1 }
 0x11b   :  { %652 = vst [vmem:[#allocation7 + $0x10] sm:$0xff] %v830_v40  ;;  %684 = vst [vmem:[#allocation7 + $0x110] sm:$0xff] %v862_v41  ;;  %v395_v42 = vpop.f32.mrb[1].mxu0  ;;  %v523_v43 = vpop.f32.mrb[1].mxu1 }
 0x11c   :  { %650 = vst [vmem:[#allocation7] sm:$0xff] %v395_v42  ;;  %682 = vst [vmem:[#allocation7 + $0x100] sm:$0xff] %v523_v43  ;;  %v831_v44 = vpop.f32.mrb[2].mxu0  ;;  %v863_v45 = vpop.f32.mrb[2].mxu1 }
 0x11d   :  { %653 = vst [vmem:[#allocation7 + $0x18] sm:$0xff] %v831_v44  ;;  %685 = vst [vmem:[#allocation7 + $0x118] sm:$0xff] %v863_v45  ;;  %v398_v46 = vpop.f32.mrb[3].mxu0  ;;  %v526_v47 = vpop.f32.mrb[3].mxu1 }
 0x11e   :  { %651 = vst [vmem:[#allocation7 + $0x8] sm:$0xff] %v398_v46  ;;  %683 = vst [vmem:[#allocation7 + $0x108] sm:$0xff] %v526_v47 }
 0x122   :  { %v834_v48 = vpop.f32.mrb[4].mxu0  ;;  %v866_v49 = vpop.f32.mrb[4].mxu1 }
 0x123   :  { %656 = vst [vmem:[#allocation7 + $0x30] sm:$0xff] %v834_v48  ;;  %688 = vst [vmem:[#allocation7 + $0x130] sm:$0xff] %v866_v49  ;;  %v411_v50 = vpop.f32.mrb[5].mxu0  ;;  %v539_v51 = vpop.f32.mrb[5].mxu1 }
 0x124   :  { %654 = vst [vmem:[#allocation7 + $0x20] sm:$0xff] %v411_v50  ;;  %686 = vst [vmem:[#allocation7 + $0x120] sm:$0xff] %v539_v51  ;;  %v835_v52 = vpop.f32.mrb[6].mxu0  ;;  %v867_v53 = vpop.f32.mrb[6].mxu1 }
 0x125   :  { %657 = vst [vmem:[#allocation7 + $0x38] sm:$0xff] %v835_v52  ;;  %689 = vst [vmem:[#allocation7 + $0x138] sm:$0xff] %v867_v53  ;;  %v414_v54 = vpop.f32.mrb[7].mxu0  ;;  %v542_v55 = vpop.f32.mrb[7].mxu1 }
 0x126   :  { %655 = vst [vmem:[#allocation7 + $0x28] sm:$0xff] %v414_v54  ;;  %687 = vst [vmem:[#allocation7 + $0x128] sm:$0xff] %v542_v55 }
 0x12a   :  { %v838_v56 = vpop.f32.mrb[8].mxu0  ;;  %v870_v57 = vpop.f32.mrb[8].mxu1 }
 0x12b   :  { %660 = vst [vmem:[#allocation7 + $0x50] sm:$0xff] %v838_v56  ;;  %692 = vst [vmem:[#allocation7 + $0x150] sm:$0xff] %v870_v57  ;;  %v427_v58 = vpop.f32.mrb[9].mxu0  ;;  %v555_v59 = vpop.f32.mrb[9].mxu1 }
 0x12c   :  { %658 = vst [vmem:[#allocation7 + $0x40] sm:$0xff] %v427_v58  ;;  %690 = vst [vmem:[#allocation7 + $0x140] sm:$0xff] %v555_v59  ;;  %v839_v60 = vpop.f32.mrb[10].mxu0  ;;  %v871_v61 = vpop.f32.mrb[10].mxu1 }
 0x12d   :  { %661 = vst [vmem:[#allocation7 + $0x58] sm:$0xff] %v839_v60  ;;  %693 = vst [vmem:[#allocation7 + $0x158] sm:$0xff] %v871_v61  ;;  %v430_v62 = vpop.f32.mrb[11].mxu0  ;;  %v558_v63 = vpop.f32.mrb[11].mxu1 }
 0x12e   :  { %659 = vst [vmem:[#allocation7 + $0x48] sm:$0xff] %v430_v62  ;;  %691 = vst [vmem:[#allocation7 + $0x148] sm:$0xff] %v558_v63 }
 0x132   :  { %v842_v0 = vpop.f32.mrb[12].mxu0  ;;  %v874_v1 = vpop.f32.mrb[12].mxu1 }
 0x133   :  { %664 = vst [vmem:[#allocation7 + $0x70] sm:$0xff] %v842_v0  ;;  %696 = vst [vmem:[#allocation7 + $0x170] sm:$0xff] %v874_v1  ;;  %v443_v2 = vpop.f32.mrb[13].mxu0  ;;  %v571_v3 = vpop.f32.mrb[13].mxu1 }
 0x134   :  { %662 = vst [vmem:[#allocation7 + $0x60] sm:$0xff] %v443_v2  ;;  %694 = vst [vmem:[#allocation7 + $0x160] sm:$0xff] %v571_v3  ;;  %v843_v4 = vpop.f32.mrb[14].mxu0  ;;  %v875_v5 = vpop.f32.mrb[14].mxu1 }
 0x135   :  { %665 = vst [vmem:[#allocation7 + $0x78] sm:$0xff] %v843_v4  ;;  %697 = vst [vmem:[#allocation7 + $0x178] sm:$0xff] %v875_v5  ;;  %v446_v6 = vpop.f32.mrb[15].mxu0  ;;  %v574_v7 = vpop.f32.mrb[15].mxu1 }
 0x136   :  { %663 = vst [vmem:[#allocation7 + $0x68] sm:$0xff] %v446_v6  ;;  %695 = vst [vmem:[#allocation7 + $0x168] sm:$0xff] %v574_v7 }
 0x13a   :  { %v846_v8 = vpop.f32.mrb[16].mxu0  ;;  %v878_v9 = vpop.f32.mrb[16].mxu1 }
 0x13b   :  { %668 = vst [vmem:[#allocation7 + $0x90] sm:$0xff] %v846_v8  ;;  %700 = vst [vmem:[#allocation7 + $0x190] sm:$0xff] %v878_v9  ;;  %v459_v10 = vpop.f32.mrb[17].mxu0  ;;  %v587_v11 = vpop.f32.mrb[17].mxu1 }
 0x13c   :  { %666 = vst [vmem:[#allocation7 + $0x80] sm:$0xff] %v459_v10  ;;  %698 = vst [vmem:[#allocation7 + $0x180] sm:$0xff] %v587_v11  ;;  %v847_v12 = vpop.f32.mrb[18].mxu0  ;;  %v879_v13 = vpop.f32.mrb[18].mxu1 }
 0x13d   :  { %669 = vst [vmem:[#allocation7 + $0x98] sm:$0xff] %v847_v12  ;;  %701 = vst [vmem:[#allocation7 + $0x198] sm:$0xff] %v879_v13  ;;  %v462_v14 = vpop.f32.mrb[19].mxu0  ;;  %v590_v15 = vpop.f32.mrb[19].mxu1 }
 0x13e   :  { %667 = vst [vmem:[#allocation7 + $0x88] sm:$0xff] %v462_v14  ;;  %699 = vst [vmem:[#allocation7 + $0x188] sm:$0xff] %v590_v15 }
 0x142   :  { %v850_v16 = vpop.f32.mrb[20].mxu0  ;;  %v882_v17 = vpop.f32.mrb[20].mxu1 }
 0x143   :  { %672 = vst [vmem:[#allocation7 + $0xb0] sm:$0xff] %v850_v16  ;;  %704 = vst [vmem:[#allocation7 + $0x1b0] sm:$0xff] %v882_v17  ;;  %v475_v18 = vpop.f32.mrb[21].mxu0  ;;  %v603_v19 = vpop.f32.mrb[21].mxu1 }
 0x144   :  { %670 = vst [vmem:[#allocation7 + $0xa0] sm:$0xff] %v475_v18  ;;  %702 = vst [vmem:[#allocation7 + $0x1a0] sm:$0xff] %v603_v19  ;;  %v851_v20 = vpop.f32.mrb[22].mxu0  ;;  %v883_v21 = vpop.f32.mrb[22].mxu1 }
 0x145   :  { %673 = vst [vmem:[#allocation7 + $0xb8] sm:$0xff] %v851_v20  ;;  %705 = vst [vmem:[#allocation7 + $0x1b8] sm:$0xff] %v883_v21  ;;  %v478_v22 = vpop.f32.mrb[23].mxu0  ;;  %v606_v23 = vpop.f32.mrb[23].mxu1 }
 0x146   :  { %671 = vst [vmem:[#allocation7 + $0xa8] sm:$0xff] %v478_v22  ;;  %703 = vst [vmem:[#allocation7 + $0x1a8] sm:$0xff] %v606_v23 }
 0x14a   :  { %v854_v24 = vpop.f32.mrb[24].mxu0  ;;  %v886_v25 = vpop.f32.mrb[24].mxu1 }
 0x14b   :  { %676 = vst [vmem:[#allocation7 + $0xd0] sm:$0xff] %v854_v24  ;;  %708 = vst [vmem:[#allocation7 + $0x1d0] sm:$0xff] %v886_v25  ;;  %v491_v26 = vpop.f32.mrb[25].mxu0  ;;  %v619_v27 = vpop.f32.mrb[25].mxu1 }
 0x14c   :  { %674 = vst [vmem:[#allocation7 + $0xc0] sm:$0xff] %v491_v26  ;;  %706 = vst [vmem:[#allocation7 + $0x1c0] sm:$0xff] %v619_v27  ;;  %v855_v28 = vpop.f32.mrb[26].mxu0  ;;  %v887_v29 = vpop.f32.mrb[26].mxu1 }
 0x14d   :  { %677 = vst [vmem:[#allocation7 + $0xd8] sm:$0xff] %v855_v28  ;;  %709 = vst [vmem:[#allocation7 + $0x1d8] sm:$0xff] %v887_v29  ;;  %v494_v30 = vpop.f32.mrb[27].mxu0  ;;  %v622_v31 = vpop.f32.mrb[27].mxu1 }
 0x14e   :  { %675 = vst [vmem:[#allocation7 + $0xc8] sm:$0xff] %v494_v30  ;;  %707 = vst [vmem:[#allocation7 + $0x1c8] sm:$0xff] %v622_v31 }
 0x152   :  { %v858_v32 = vpop.f32.mrb[28].mxu0  ;;  %v890_v33 = vpop.f32.mrb[28].mxu1 }
 0x153   :  { %680 = vst [vmem:[#allocation7 + $0xf0] sm:$0xff] %v858_v32  ;;  %712 = vst [vmem:[#allocation7 + $0x1f0] sm:$0xff] %v890_v33  ;;  %v507_v34 = vpop.f32.mrb[29].mxu0  ;;  %v635_v35 = vpop.f32.mrb[29].mxu1 }
 0x154   :  { %678 = vst [vmem:[#allocation7 + $0xe0] sm:$0xff] %v507_v34  ;;  %710 = vst [vmem:[#allocation7 + $0x1e0] sm:$0xff] %v635_v35  ;;  %v859_v36 = vpop.f32.mrb[30].mxu0  ;;  %v891_v37 = vpop.f32.mrb[30].mxu1 }
 0x155   :  { %681 = vst [vmem:[#allocation7 + $0xf8] sm:$0xff] %v859_v36  ;;  %713 = vst [vmem:[#allocation7 + $0x1f8] sm:$0xff] %v891_v37  ;;  %v510_v38 = vpop.f32.mrb[31].mxu0  ;;  %v638_v39 = vpop.f32.mrb[31].mxu1 }
 0x156   :  { %679 = vst [vmem:[#allocation7 + $0xe8] sm:$0xff] %v510_v38  ;;  %711 = vst [vmem:[#allocation7 + $0x1e8] sm:$0xff] %v638_v39 }
 0x157   :  { %1010 = shalt.err (!%p1007_p6)
}
 0x158   :  { %s1011_s10 = scalar_lea.hbm %s1087_s2, 8192 }
 0x159   :  { %p1012_p7 = scmp.ne.s32.totalorder %s1087_s2, %s1011_s10  ;;  %p1015_p8 = scmp.lt.u32.totalorder %s1011_s10, %s1087_s2 }
 0x15b   :  { %p1017_p9 = pnand %p1015_p8, %p1012_p7 }
 0x15d   :  { %1020 = shalt.err (!%p1017_p9)
}
 0x15e   :  { %s1032_s15 = smov 128   ;;  %s1033_s16 = smov 8  }
 0x15f   :  { %725 = dma.vmem_to_hbm [thread:$0]  %s720_s6, 8192, %s1087_s2, [#allocation4], %s1032_s15, %s1032_s15, %s1033_s16  }
 0x160   :  { %1025 = dma.done.wait [#allocation4], 8192  }
 0x161   :  { %1026 = vsyncadd [#allocation4], 4294959104 }
 0x162   :  { %729 = vsyncpa [#allocation3], 1 }
 0x163   :  { %730 = vsyncpa [#allocation6], 1 }
 0x164   :  { %731 = vsyncpa [#allocation4], 1 }

</bundles_post_ra>
